<compile_context>
chip_gen: v6e
topology: v6e:2x2x1
jax: 0.10.0
libtpu: 0.0.40
codegen_flags: <defaults>
</compile_context>

<pallas_src>
import functools
import math

import jax
import jax.numpy as jnp
from jax.experimental import pallas as pl
from jax.experimental.pallas import tpu as pltpu


def _fastconvformer_kernel(x_ref, w_ref, gamma_ref, beta_ref, o_ref, xp_ref,
                           *, eps, conv_size):
    """One (Bt, S, H) batch-packed block per grid step.

    x_ref:     (Bt, S, H)          input block (only HBM stream; also residual)
    w_ref:     (C, H)              per-hidden-channel taps, pre-scaled by 1/sqrt(S)
    gamma_ref: (1, 1, H)           LayerNorm weight
    beta_ref:  (1, 1, H)           LayerNorm bias
    o_ref:     (Bt, S, H)          output block
    xp_ref:    (Bt, S + C - 1, H)  VMEM scratch: circularly padded copy of x
    """
    C = conv_size
    S = x_ref.shape[1]

    x = x_ref[...]                                   # (Bt, S, H) f32

    # Circular depthwise conv: out[n, h] = sum_k w[k, h] * x[(n - k) mod S, h].
    # Tap 0 needs no shift; 'ortho' 1/sqrt(S) is already folded into w.
    acc = x * w_ref[0, :]

    if C > 1:
        # Build the circularly padded window once, in VMEM only:
        #   xp = [ x[S-(C-1):], x ]  along the sequence axis.
        xp_ref[:, C - 1:, :] = x
        xp_ref[:, :C - 1, :] = x_ref[:, S - (C - 1):, :]
        for k in range(1, C):                        # small static unroll
            off = C - 1 - k
            acc = acc + xp_ref[:, off:off + S, :] * w_ref[k, :]

    # TODO(synk): out_dropout is identity in eval mode; training-mode dropout
    # (stateful PRNG masking) is not implemented here.
    y = acc + x                                      # residual

    # LayerNorm over hidden (lane) axis: biased variance, PyTorch-style eps.
    mean = jnp.mean(y, axis=-1, keepdims=True)
    var = jnp.mean(jnp.square(y - mean), axis=-1, keepdims=True)
    normed = (y - mean) * jax.lax.rsqrt(var + eps)
    o_ref[...] = normed * gamma_ref[...] + beta_ref[...]


def _pick_block_batch(B, S, H, target_block_bytes):
    """Largest divisor of B whose (Bt,S,H) f32 block fits the target size,
    but keep >= 2 grid steps when B allows (megacore sharding on v7x)."""
    per_batch_bytes = S * H * 4
    bt = 1
    for cand in range(1, B + 1):
        if B % cand == 0 and cand * per_batch_bytes <= target_block_bytes:
            bt = cand
    if B // bt < 2:
        for cand in range(bt, 0, -1):
            if B % cand == 0 and B // cand >= 2:
                bt = cand
                break
    return bt


def fastconvformer_layer(x, conv_weight, gamma, beta, *, eps,
                         block_batch=None, target_block_bytes=2 << 20):
    """x: (B, S, H) f32; conv_weight: (1, C, H) f32; gamma/beta: (H,) f32."""
    B, S, H = x.shape
    C = conv_weight.shape[1]
    assert C <= S, "conv_size must not exceed the sequence length"

    Bt = block_batch if block_batch is not None else _pick_block_batch(
        B, S, H, target_block_bytes)
    assert B % Bt == 0

    # Fold the 'ortho' FFT scaling (1/sqrt(S)) into the tiny (C, H) weight.
    w = (conv_weight[0] * (1.0 / math.sqrt(S))).astype(jnp.float32)
    gamma3 = gamma.reshape(1, 1, H).astype(jnp.float32)
    beta3 = beta.reshape(1, 1, H).astype(jnp.float32)

    blk_bytes = Bt * S * H * 4
    xp_bytes = Bt * (S + C - 1) * H * 4
    # double-buffered in+out blocks + scratch + slack; safe on v7x (64 MiB VMEM).
    vmem_limit = int(min(32 * 2**20,
                         max(16 * 2**20, 4 * blk_bytes + xp_bytes + (2 << 20))))

    kernel = functools.partial(
        _fastconvformer_kernel, eps=float(eps), conv_size=C)

    return pl.pallas_call(
        kernel,
        out_shape=jax.ShapeDtypeStruct((B, S, H), jnp.float32),
        grid_spec=pltpu.PrefetchScalarGridSpec(
            num_scalar_prefetch=0,
            grid=(B // Bt,),
            in_specs=[
                pl.BlockSpec((Bt, S, H), lambda b: (b, 0, 0)),
                pl.BlockSpec((C, H), lambda b: (0, 0)),
                pl.BlockSpec((1, 1, H), lambda b: (0, 0, 0)),
                pl.BlockSpec((1, 1, H), lambda b: (0, 0, 0)),
            ],
            out_specs=pl.BlockSpec((Bt, S, H), lambda b: (b, 0, 0)),
            scratch_shapes=[pltpu.VMEM((Bt, S + C - 1, H), jnp.float32)],
        ),
        compiler_params=pltpu.CompilerParams(
            dimension_semantics=("parallel",),
            vmem_limit_bytes=vmem_limit,
        ),
    )(x, w, gamma3, beta3)


def _reference_forward(x, conv_weight, gamma, beta, *, eps, max_seq_len):
    """Pure-JAX replica of the PyTorch forward (FFT path), eval mode."""
    B, S, H = x.shape
    C = conv_weight.shape[1]
    X = jnp.fft.rfft(x, axis=1, norm="ortho")
    w_full = jnp.concatenate(
        [conv_weight, jnp.zeros((1, max_seq_len - C, H), jnp.float32)], axis=1)
    W = jnp.fft.rfft(w_full, axis=1, norm="ortho")
    hs = jnp.fft.irfft(X * W, n=S, axis=1, norm="ortho").astype(jnp.float32)
    y = hs + x
    mean = y.mean(-1, keepdims=True)
    var = ((y - mean) ** 2).mean(-1, keepdims=True)
    return (y - mean) / jnp.sqrt(var + eps) * gamma + beta


if __name__ == "__main__":
    # Module hyper-parameters (small, consistent with the forward pass).
    # seq_len must equal max_seq_len for the PyTorch frequency-domain product.
    CONV_SIZE = 3
    LAYER_NORM_EPS = 1e-12

    key = jax.random.PRNGKey(0)
    k_x, k_w, k_x2 = jax.random.split(key, 3)

    # --- case 1: tiny shapes (B=2 -> Bt=1, grid of 2) -----------------------
    B, S, H = 2, 16, 32
    x = jax.random.normal(k_x, (B, S, H), dtype=jnp.float32)
    conv_weight = 0.02 * jax.random.normal(k_w, (1, CONV_SIZE, H),
                                           dtype=jnp.float32)
    gamma = jnp.ones((H,), jnp.float32)       # nn.LayerNorm default init
    beta = jnp.zeros((H,), jnp.float32)

    out = fastconvformer_layer(x, conv_weight, gamma, beta, eps=LAYER_NORM_EPS)
    out = jax.block_until_ready(out)
    ref = _reference_forward(x, conv_weight, gamma, beta,
                             eps=LAYER_NORM_EPS, max_seq_len=S)
    assert out.shape == (B, S, H) and out.dtype == jnp.float32
    assert jnp.allclose(out, ref, rtol=1e-4, atol=1e-4), (
        f"max abs err {jnp.max(jnp.abs(out - ref))}")

    # --- case 2: exercise batch-packed blocks (B=8 -> Bt=4, grid of 2) ------
    B2 = 8
    x2 = jax.random.normal(k_x2, (B2, S, H), dtype=jnp.float32)
    out2 = fastconvformer_layer(x2, conv_weight, gamma, beta,
                                eps=LAYER_NORM_EPS)
    out2 = jax.block_until_ready(out2)
    ref2 = _reference_forward(x2, conv_weight, gamma, beta,
                              eps=LAYER_NORM_EPS, max_seq_len=S)
    assert jnp.allclose(out2, ref2, rtol=1e-4, atol=1e-4), (
        f"max abs err {jnp.max(jnp.abs(out2 - ref2))}")

    print("KERNEL_OK")
</pallas_src>

<mosaic_0001>
module attributes {stable_mosaic.version = 11 : i64} {
  func.func @_fastconvformer_kernel(%arg0: i32, %arg1: memref<1x16x32xf32, #tpu.memory_space<vmem>>, %arg2: memref<3x32xf32, #tpu.memory_space<vmem>>, %arg3: memref<1x1x32xf32, #tpu.memory_space<vmem>>, %arg4: memref<1x1x32xf32, #tpu.memory_space<vmem>>, %arg5: memref<1x16x32xf32, #tpu.memory_space<vmem>>, %arg6: memref<1x18x32xf32, #tpu.memory_space<vmem>>) attributes {dimension_semantics = [#tpu.dimension_semantics<parallel>], iteration_bounds = array<i64: 2>, scalar_prefetch = 0 : i64, scratch_operands = 1 : i64, tpu.core_type = #tpu.core_type<tc>, window_params = [{transform_indices = @transform_0, window_bounds = array<i64: 1, 16, 32>}, {pipeline_mode = #tpu.pipeline_mode<synchronous>, transform_indices = @transform_1, window_bounds = array<i64: 3, 32>}, {pipeline_mode = #tpu.pipeline_mode<synchronous>, transform_indices = @transform_2, window_bounds = array<i64: 1, 1, 32>}, {pipeline_mode = #tpu.pipeline_mode<synchronous>, transform_indices = @transform_3, window_bounds = array<i64: 1, 1, 32>}, {transform_indices = @transform_4, window_bounds = array<i64: 1, 16, 32>}]} {
    %c0 = arith.constant 0 : index
    %c0_0 = arith.constant 0 : index
    %c0_1 = arith.constant 0 : index
    %0 = vector.load %arg1[%c0, %c0_0, %c0_1] : memref<1x16x32xf32, #tpu.memory_space<vmem>>, vector<1x16x32xf32>
    %c0_2 = arith.constant 0 : index
    %c0_3 = arith.constant 0 : index
    %1 = vector.load %arg2[%c0_2, %c0_3] : memref<3x32xf32, #tpu.memory_space<vmem>>, vector<1x32xf32>
    %2 = vector.shape_cast %1 : vector<1x32xf32> to vector<32xf32>
    %3 = vector.shape_cast %2 : vector<32xf32> to vector<1x1x32xf32>
    %4 = vector.broadcast %3 : vector<1x1x32xf32> to vector<1x16x32xf32>
    %5 = arith.mulf %0, %4 : vector<1x16x32xf32>
    %c0_4 = arith.constant 0 : index
    %c2 = arith.constant 2 : index
    %c0_5 = arith.constant 0 : index
    %6 = vector.load %arg6[%c0_4, %c2, %c0_5] : memref<1x18x32xf32, #tpu.memory_space<vmem>>, vector<1x16x32xf32>
    tpu.vector_store %arg6[%c0_4, %c2, %c0_5], %0 {strides = array<i32>} : memref<1x18x32xf32, #tpu.memory_space<vmem>>, vector<1x16x32xf32>,
    %c0_6 = arith.constant 0 : index
    %c14 = arith.constant 14 : index
    %c0_7 = arith.constant 0 : index
    %7 = vector.load %arg1[%c0_6, %c14, %c0_7] : memref<1x16x32xf32, #tpu.memory_space<vmem>>, vector<1x2x32xf32>
    %c0_8 = arith.constant 0 : index
    %c0_9 = arith.constant 0 : index
    %c0_10 = arith.constant 0 : index
    %8 = vector.load %arg6[%c0_8, %c0_9, %c0_10] : memref<1x18x32xf32, #tpu.memory_space<vmem>>, vector<1x2x32xf32>
    tpu.vector_store %arg6[%c0_8, %c0_9, %c0_10], %7 {strides = array<i32>} : memref<1x18x32xf32, #tpu.memory_space<vmem>>, vector<1x2x32xf32>,
    %c0_11 = arith.constant 0 : index
    %c1 = arith.constant 1 : index
    %c0_12 = arith.constant 0 : index
    %9 = vector.load %arg6[%c0_11, %c1, %c0_12] : memref<1x18x32xf32, #tpu.memory_space<vmem>>, vector<1x16x32xf32>
    %c1_13 = arith.constant 1 : index
    %c0_14 = arith.constant 0 : index
    %10 = vector.load %arg2[%c1_13, %c0_14] : memref<3x32xf32, #tpu.memory_space<vmem>>, vector<1x32xf32>
    %11 = vector.shape_cast %10 : vector<1x32xf32> to vector<32xf32>
    %12 = vector.shape_cast %11 : vector<32xf32> to vector<1x1x32xf32>
    %13 = vector.broadcast %12 : vector<1x1x32xf32> to vector<1x16x32xf32>
    %14 = arith.mulf %9, %13 : vector<1x16x32xf32>
    %15 = arith.addf %5, %14 : vector<1x16x32xf32>
    %c0_15 = arith.constant 0 : index
    %c0_16 = arith.constant 0 : index
    %c0_17 = arith.constant 0 : index
    %16 = vector.load %arg6[%c0_15, %c0_16, %c0_17] : memref<1x18x32xf32, #tpu.memory_space<vmem>>, vector<1x16x32xf32>
    %c2_18 = arith.constant 2 : index
    %c0_19 = arith.constant 0 : index
    %17 = vector.load %arg2[%c2_18, %c0_19] : memref<3x32xf32, #tpu.memory_space<vmem>>, vector<1x32xf32>
    %18 = vector.shape_cast %17 : vector<1x32xf32> to vector<32xf32>
    %19 = vector.shape_cast %18 : vector<32xf32> to vector<1x1x32xf32>
    %20 = vector.broadcast %19 : vector<1x1x32xf32> to vector<1x16x32xf32>
    %21 = arith.mulf %16, %20 : vector<1x16x32xf32>
    %22 = arith.addf %15, %21 : vector<1x16x32xf32>
    %23 = arith.addf %22, %0 : vector<1x16x32xf32>
    %cst = arith.constant dense<0.000000e+00> : vector<1x16xf32>
    %24 = vector.multi_reduction <add>, %23, %cst [2] : vector<1x16x32xf32> to vector<1x16xf32>
    %25 = vector.shape_cast %24 : vector<1x16xf32> to vector<1x16x1xf32>
    %cst_20 = arith.constant 3.200000e+01 : f32
    %26 = vector.broadcast %cst_20 : f32 to vector<1x16x1xf32>
    %27 = arith.divf %25, %26 : vector<1x16x1xf32>
    %28 = vector.broadcast %27 : vector<1x16x1xf32> to vector<1x16x32xf32>
    %29 = arith.subf %23, %28 : vector<1x16x32xf32>
    %30 = arith.mulf %29, %29 : vector<1x16x32xf32>
    %cst_21 = arith.constant dense<0.000000e+00> : vector<1x16xf32>
    %31 = vector.multi_reduction <add>, %30, %cst_21 [2] : vector<1x16x32xf32> to vector<1x16xf32>
    %32 = vector.shape_cast %31 : vector<1x16xf32> to vector<1x16x1xf32>
    %cst_22 = arith.constant 3.200000e+01 : f32
    %33 = vector.broadcast %cst_22 : f32 to vector<1x16x1xf32>
    %34 = arith.divf %32, %33 : vector<1x16x1xf32>
    %35 = vector.broadcast %27 : vector<1x16x1xf32> to vector<1x16x32xf32>
    %36 = arith.subf %23, %35 : vector<1x16x32xf32>
    %cst_23 = arith.constant 9.99999996E-13 : f32
    %37 = vector.broadcast %cst_23 : f32 to vector<1x16x1xf32>
    %38 = arith.addf %34, %37 : vector<1x16x1xf32>
    %39 = math.rsqrt %38 : vector<1x16x1xf32>
    %40 = vector.broadcast %39 : vector<1x16x1xf32> to vector<1x16x32xf32>
    %41 = arith.mulf %36, %40 : vector<1x16x32xf32>
    %c0_24 = arith.constant 0 : index
    %c0_25 = arith.constant 0 : index
    %c0_26 = arith.constant 0 : index
    %42 = vector.load %arg3[%c0_24, %c0_25, %c0_26] : memref<1x1x32xf32, #tpu.memory_space<vmem>>, vector<1x1x32xf32>
    %43 = vector.broadcast %42 : vector<1x1x32xf32> to vector<1x16x32xf32>
    %44 = arith.mulf %41, %43 : vector<1x16x32xf32>
    %c0_27 = arith.constant 0 : index
    %c0_28 = arith.constant 0 : index
    %c0_29 = arith.constant 0 : index
    %45 = vector.load %arg4[%c0_27, %c0_28, %c0_29] : memref<1x1x32xf32, #tpu.memory_space<vmem>>, vector<1x1x32xf32>
    %46 = vector.broadcast %45 : vector<1x1x32xf32> to vector<1x16x32xf32>
    %47 = arith.addf %44, %46 : vector<1x16x32xf32>
    %c0_30 = arith.constant 0 : index
    %c0_31 = arith.constant 0 : index
    %c0_32 = arith.constant 0 : index
    %48 = vector.load %arg5[%c0_30, %c0_31, %c0_32] : memref<1x16x32xf32, #tpu.memory_space<vmem>>, vector<1x16x32xf32>
    tpu.vector_store %arg5[%c0_30, %c0_31, %c0_32], %47 {strides = array<i32>} : memref<1x16x32xf32, #tpu.memory_space<vmem>>, vector<1x16x32xf32>,
    return
  }
  func.func @transform_0(%arg0: i32) -> (i32, i32, i32) {
    %c0_i32 = arith.constant 0 : i32
    %c0_i32_0 = arith.constant 0 : i32
    %c0_i32_1 = arith.constant 0 : i32
    return %arg0, %c0_i32, %c0_i32_0 : i32, i32, i32
  }
  func.func @transform_1(%arg0: i32) -> (i32, i32) {
    %c0_i32 = arith.constant 0 : i32
    %c0_i32_0 = arith.constant 0 : i32
    %c0_i32_1 = arith.constant 0 : i32
    return %c0_i32, %c0_i32_0 : i32, i32
  }
  func.func @transform_2(%arg0: i32) -> (i32, i32, i32) {
    %c0_i32 = arith.constant 0 : i32
    %c0_i32_0 = arith.constant 0 : i32
    %c0_i32_1 = arith.constant 0 : i32
    %c0_i32_2 = arith.constant 0 : i32
    return %c0_i32, %c0_i32_0, %c0_i32_1 : i32, i32, i32
  }
  func.func @transform_3(%arg0: i32) -> (i32, i32, i32) {
    %c0_i32 = arith.constant 0 : i32
    %c0_i32_0 = arith.constant 0 : i32
    %c0_i32_1 = arith.constant 0 : i32
    %c0_i32_2 = arith.constant 0 : i32
    return %c0_i32, %c0_i32_0, %c0_i32_1 : i32, i32, i32
  }
  func.func @transform_4(%arg0: i32) -> (i32, i32, i32) {
    %c0_i32 = arith.constant 0 : i32
    %c0_i32_0 = arith.constant 0 : i32
    %c0_i32_1 = arith.constant 0 : i32
    return %arg0, %c0_i32, %c0_i32_0 : i32, i32, i32
  }
}

</mosaic_0001>

<bundles_post_ra>
// kernel: tpu_custom_call.1
= control target key start
LH: loop header
LB: loop body
LE: loop exit
PB: predicated region body
PF: predicated region fallthrough
CT: control target
= control target key end

     0   :  { %9 = vsyncpa [#allocation4], 0  ;;  %s855_s0 = inlined_call_operand.hbm [shape: f32[2,16,32], index: 0, kind: input, shape index: {}]   ;;  %s856_s1 = inlined_call_operand.hbm [shape: f32[3,32], index: 1, kind: input, shape index: {}]   ;;  %s857_s2 = inlined_call_operand.vmem [shape: f32[1,1,32], index: 2, kind: input, shape index: {}]   ;;  %s858_s3 = inlined_call_operand.vmem [shape: f32[1,1,32], index: 3, kind: input, shape index: {}]   ;;  %s859_s4 = inlined_call_operand.hbm [shape: f32[2,16,32], index: 4, kind: output, shape index: {}]  }
   0x1   :  { %11 = vsyncpa [#allocation4 + $0x1], 0 }
   0x2   :  { %12 = vsyncpa [#allocation7], 0 }
   0x3   :  { %13 = vsyncpa [#allocation5], 0 }
   0x4   :  { %15 = vsyncpa [#allocation5 + $0x1], 0  ;;  %s656_s15 = smov 0   ;;  %s658_s16 = smov 0  }
   0x5   :  { %s660_s17 = smov 0   ;;  %s662_s18 = smov 0  }
   0x6 LB: > { %s677_s19 = sadd.s32 4294967295, %s622_s18   ;;  %s412_s20 = sadd.s32 4294967294, %s622_s18   ;;  %s622_s18 = sphi %s662_s18, %s882_s18   ;;  %s618_s17 = sphi %s660_s17, %s881_s17   ;;  %s614_s16 = sphi %s658_s16, %s880_s16   ;;  %s610_s15 = sphi %s656_s15, %s879_s15  }
   0x7   : > { %s681_s21 = sadd.s32 1, %s622_s18   ;;  %s28_s22 = sadd.s32 1, %s618_s17 }
   0x8   : > { %s25_s23 = ssub.s32 %s622_s18, %s681_s21  ;;  %p35_p0 = scmp.ne.s32.totalorder %s618_s17, %s614_s16 }
   0x9   : > { %p26_p1 = scmp.eq.s32.totalorder %s25_s23, 0  ;;  %p36_p2 = scmp.eq.s32.totalorder %s622_s18, 0 }
   0xa   : > { %p41_p3 = scmp.ne.s32.totalorder %s614_s16, %s610_s15  ;;  %p860_p4 = scmp.eq.s32.totalorder %s677_s19, 0 }
   0xb   : > { %s693_s24 = scalar_select %p26_p1, %s618_s17, %s28_s22  }
   0xc   : > { %p695_p5 = por %p36_p2, %p35_p0  ;;  %p701_p6 = por %p860_p4, %p41_p3 }
   0xd   : > { %p128_p7 = scmp.eq.s32.totalorder %s677_s19, 1  ;;  %p134_p8 = scmp.eq.s32.totalorder %s412_s20, 1 }
   0xe   : > { %s865_s26 = scalar_select %p701_p6, 1, 0 }
   0xf   : > { %p413_p9 = scmp.ge.s32.totalorder %s622_s18, 1  ;;  %p141_p10 = scmp.lt.s32.totalorder %s622_s18, 3 }
  0x10   : > { %p708_p11 = por %p128_p7, %p35_p0  ;;  %p712_p12 = por %p134_p8, %p41_p3 }
  0x11   : > { %p716_p13 = pnand %p413_p9, %p141_p10  ;;  %s624_s30 = smov [#allocation6]  }
  0x12   : > { %s866_s27 = scalar_select %p708_p11, 1, 0 }
  0x13   : > { %s867_s28 = scalar_select %p712_p12, 1, 0 }
  0x14   : > { %s868_s29 = scalar_select %p716_p13, 1, 0 }
  0x15   : > { %p443_p2 = pneg %p716_p13  ;;  %s154_s5 = sshll.u32 %s624_s30, 4  ;;  %s155_s5 = int_to_ptr.vmem [resolvable:$true] %s154_s5 }
  0x16   : > { %p456_p4 = scmp.lt.s32.totalorder %s622_s18, 2  ;;  %p869_p0 = scmp.eq.s32.totalorder %s677_s19, 0 }
  0x17   : > { %s171_s7 = sand.u32 1, %s618_s17   ;;  %s511_s10 = scalar_lea.vmem %s155_s5, 64 }
  0x18   : > { %p726_p7 = pnand %p443_p2, %p869_p0  ;;  %p733_p3 = pnand %p456_p4, %p695_p5 }
  0x19   : > { %s416_s9 = sshll.u32 %s171_s7, 4  ;;  %p512_p9 = scmp.ne.s32.totalorder %s155_s5, %s511_s10 }
  0x1a   : > { %p502_p8 = pneg %p726_p7  ;;  %p519_p12 = scmp.lt.s32.totalorder %s155_s5, %s155_s5 }
  0x1b   : > { %p520_p11 = scmp.lt.s32.totalorder %s511_s10, %s511_s10 }
  0x1c   : > { %p514_p10 = pnand %p512_p9, %p502_p8 }
  0x1d   : > { %p521_p2 = por %p520_p11, %p519_p12 }
  0x1e   : > { %p515_p1 = pneg %p514_p10 }
  0x20   : > { %p522_p0 = pnand %p521_p2, %p515_p1 }
  0x22   : > { %525 = shalt.err (!%p522_p0)
}
  0x23   : > { %446 = dma.hbm_to_vmem [thread:$0]  (!%p726_p7), %s856_s1, 64, %s155_s5, [#allocation7]  }
  0x24   : > { %s433_s13 = sshll.u32 %s622_s18, 8  ;;  %s175_s14 = scalar_lea.vmem [#allocation3], %s416_s9 }
  0x25   : > { %s182_s20 = sshll.u32 %s175_s14, 4  ;;  %s748_s25 = scalar_lea.hbm %s855_s0, %s433_s13  ;;  %s750_s20 = int_to_ptr.vmem [resolvable:$true] %s182_s20 }
  0x26   : > { %s752_s30 = scalar_lea.sflag [#allocation4], %s171_s7  ;;  %s526_s6 = scalar_lea.hbm %s748_s25, 256 }
  0x27   : > { %p527_p4 = scmp.ne.s32.totalorder %s748_s25, %s526_s6  ;;  %p528_p5 = pneg %p733_p3 }
  0x28   : > { %s531_s10 = scalar_lea.hbm %s855_s0, 512  ;;  %p532_p1 = scmp.lt.s32.totalorder %s748_s25, %s855_s0 }
  0x29   : > { %p529_p11 = pnand %p528_p5, %p527_p4  ;;  %p533_p7 = scmp.lt.s32.totalorder %s531_s10, %s526_s6 }
  0x2b   : > { %p530_p12 = pneg %p529_p11  ;;  %p534_p8 = por %p533_p7, %p532_p1 }
  0x2d   : > { %p535_p9 = pnand %p534_p8, %p530_p12 }
  0x2f   : > { %538 = shalt.err (!%p535_p9)
}
  0x30   : > { %s539_s7 = scalar_lea.vmem %s750_s20, 256  ;;  %s625_s13 = smov [#allocation3]  }
  0x31   : > { %p540_p10 = scmp.ne.s32.totalorder %s750_s20, %s539_s7  ;;  %s544_s14 = sshll.u32 %s625_s13, 4  ;;  %s545_s14 = int_to_ptr.vmem [resolvable:$false] %s544_s14 }
  0x32   : > { %s546_s22 = scalar_lea.vmem %s545_s14, 512  ;;  %p547_p4 = scmp.lt.s32.totalorder %s750_s20, %s545_s14 }
  0x33   : > { %p542_p2 = pnand %p540_p10, %p528_p5  ;;  %p548_p11 = scmp.lt.s32.totalorder %s546_s22, %s539_s7 }
  0x35   : > { %p543_p0 = pneg %p542_p2  ;;  %p549_p6 = por %p548_p11, %p547_p4 }
  0x37   : > { %p550_p13 = pnand %p549_p6, %p543_p0 }
  0x39   : > { %553 = shalt.err (!%p550_p13)
}
  0x3a   : > { %s626_s23 = smov 128   ;;  %s627_s6 = smov 8  }
  0x3b   : > { %450 = dma.hbm_to_vmem [thread:$0]  (!%p733_p3), %s748_s25, 256, %s750_s20, %s752_s30, %s626_s23, %s626_s23, %s627_s6  }
  0x3c   : > { %p872_p5 = scmp.ne.s32.totalorder %s868_s29, 0 }
  0x3d   : > { %s776_s5 = sand.u32 (!%p872_p5), 1, %s614_s16   ;;  %p873_p6 = scmp.ne.s32.totalorder (!%p872_p5), %s865_s26, 0 }
  0x3e   : > { %194 = sbr.rel (%p872_p5) target bundleno = 415 (0x19f), region = 36  ;;  %s420_s9 = sshll.u32 (!%p872_p5), %s776_s5, 4 }
  0x3f   : > { %s197_s10 = scalar_lea.sflag (!%p872_p5), [#allocation4], %s776_s5  ;;  %s200_s11 = scalar_lea.vmem (!%p872_p5), [#allocation3], %s420_s9 }
  0x43   : > { %597 = dma.done.wait (%p873_p6), %s197_s10, 256  }
  0x44   : > { %599 = vsyncadd (%p873_p6), %s197_s10, 4294967040  ;;  %p874_p13 = scmp.eq.s32.totalorder %s677_s19, 0 }
  0x46   : > { %601 = dma.done.wait (%p874_p13), [#allocation7], 64   ;;  %p875_p3 = pmov %p874_p13 }
  0x47   : > { %vm238_vm0 = vcmask 261120   ;;  %vm242_vm1 = vcmask 254976   ;;  %v229_v0 = vld [vmem:[%s200_s11] sm:$0xff]  ;;  %v241_v1 = vld [vmem:[%s200_s11 + $0xe] sm:$0x3]  ;;  %s434_s25 = sshll.u32 %s677_s19, 8 }
  0x48   : > { %603 = vsyncadd (%p875_p3), [#allocation7], 4294967232  ;;  %239 = vst.msk [vmem:[#allocation2 + $0x2] sm:$0xff] %vm238_vm0, %v229_v0  ;;  %v230_v2 = vld [vmem:[%s200_s11 + $0x8] sm:$0xff]  ;;  %v423_v3 = vld [vmem:[#allocation6] ss:$0 sm:$0xff]  ;;  %s809_s14 = scalar_lea.hbm %s859_s4, %s434_s25 }
  0x49   : > { %243 = vst.msk [vmem:[#allocation2] sm:$0x3] %vm242_vm1, %v241_v1  ;;  %v424_v4 = vld [vmem:[#allocation6 + $0x1] ss:$0 sm:$0xff]  ;;  %v425_v5 = vld [vmem:[#allocation6 + $0x2] ss:$0 sm:$0xff]  ;;  %v236_v6 = vmul.f32 %v423_v3, %v229_v0  ;;  %v237_v9 = vmul.f32 %v423_v3, %v230_v2 }
  0x4a   : > { %240 = vst.msk [vmem:[#allocation2 + $0xa] sm:$0xff] %vm238_vm0, %v230_v2  ;;  %v426_v41 = vld [vmem:[%s857_s2] ss:$0 sm:$0xff]  ;;  %s228_s30 = scalar_lea.vmem [#allocation8], %s420_s9  ;;  %s316_s19 = scalar_lea.sflag [#allocation5], %s776_s5 }
  0x4b   : > { %v427_v43 = vld [vmem:[%s858_s3] ss:$0 sm:$0xff]  ;;  %s329_s12 = sshll.u32 %s228_s30, 4  ;;  %p876_p1 = scmp.ne.s32.totalorder %s866_s27, 0  ;;  %s811_s12 = int_to_ptr.vmem [resolvable:$true] %s329_s12 }
  0x4c   : > { %s554_s22 = scalar_lea.vmem %s811_s12, 256  ;;  %s628_s23 = smov [#allocation8]  }
  0x4d   : > { %p555_p12 = scmp.ne.s32.totalorder %s811_s12, %s554_s22  ;;  %s558_s6 = sshll.u32 %s628_s23, 4  ;;  %s559_s6 = int_to_ptr.vmem [resolvable:$false] %s558_s6 }
  0x4e   : > { %s560_s9 = scalar_lea.vmem %s559_s6, 512  ;;  %p561_p9 = scmp.lt.s32.totalorder %s811_s12, %s559_s6 }
  0x4f   : > { %p556_p7 = pnand %p555_p12, %p876_p1  ;;  %p562_p10 = scmp.lt.s32.totalorder %s560_s9, %s554_s22 }
  0x50   : > { %v244_v7 = vld [vmem:[#allocation2 + $0x1] sm:$0xff] }
  0x51   : > { %v255_v8 = vld [vmem:[#allocation2] sm:$0xff]  ;;  %v251_v10 = vmul.f32 %v424_v4, %v244_v7  ;;  %v245_v12 = vld [vmem:[#allocation2 + $0x9] sm:$0xff]  ;;  %p557_p8 = pneg %p556_p7  ;;  %p563_p2 = por %p562_p10, %p561_p9 }
  0x52   : > { %v262_v11 = vmul.f32 %v425_v5, %v255_v8  ;;  %v256_v13 = vld [vmem:[#allocation2 + $0x8] sm:$0xff]  ;;  %v252_v14 = vmul.f32 %v424_v4, %v245_v12 }
  0x53   : > { %v263_v15 = vmul.f32 %v425_v5, %v256_v13  ;;  %v253_v16 = vadd.f32 %v251_v10, %v236_v6  ;;  %p564_p0 = pnand %p563_p2, %p557_p8 }
  0x54   : > { %v254_v17 = vadd.f32 %v252_v14, %v237_v9 }
  0x55   : > { %v264_v18 = vadd.f32 %v262_v11, %v253_v16 }
  0x56   : > { %v265_v19 = vadd.f32 %v263_v15, %v254_v17 }
  0x57   : > { %v266_v20 = vadd.f32 %v264_v18, %v229_v0 }
  0x58   : > { %v267_v21 = vadd.f32 %v265_v19, %v230_v2 }
  0x59   : > { %v268_v22 = vsel %vm238_vm0, %v266_v20, 0.0 }
  0x5a   : > { %269 = vadd.xlane.f32.xlu0 %v268_v22  ;;  %v271_v23 = vsel %vm238_vm0, %v267_v21, 0.0 }
  0x5e   : > { %272 = vadd.xlane.f32.xlu0 %v271_v23 }
  0xe3   : > { %v270_v24 = vpop.xlane.xlu0 %269 }
  0xe4   : > { %v275_v25 = vmul.f32 0.03125, %v270_v24 }
  0xe6   : > { %v277_v26 = vsub.f32 %v266_v20, %v275_v25 }
  0xe7   : > { %v273_v27 = vpop.xlane.xlu0 %272 }
  0xe8   : > { %v276_v28 = vmul.f32 0.03125, %v273_v27  ;;  %v279_v29 = vmul.f32 %v277_v26, %v277_v26 }
  0xea   : > { %v278_v30 = vsub.f32 %v267_v21, %v276_v28  ;;  %v281_v31 = vsel %vm238_vm0, %v279_v29, 0.0 }
  0xeb   : > { %282 = vadd.xlane.f32.xlu1 %v281_v31 }
  0xec   : > { %v280_v32 = vmul.f32 %v278_v30, %v278_v30 }
  0xee   : > { %v284_v33 = vsel %vm238_vm0, %v280_v32, 0.0 }
  0xef   : > { %285 = vadd.xlane.f32.xlu1 %v284_v33 }
 0x174   : > { %v283_v34 = vpop.xlane.xlu1 %282 }
 0x175   : > { %v287_v35 = vmul.f32 0.03125, %v283_v34 }
 0x177   : > { %v289_v36 = vadd.f32 1e-12, %v287_v35 }
 0x178   : > { %v286_v37 = vpop.xlane.xlu1 %285 }
 0x179   : > { %496 = vrsqrt.f32 %v289_v36  ;;  %v288_v38 = vmul.f32 0.03125, %v286_v37 }
 0x17b   : > { %v290_v39 = vadd.f32 1e-12, %v288_v38 }
 0x17d   : > { %498 = vrsqrt.f32 %v290_v39 }
 0x186   : > { %v497_v40 = vpop.eup %496 }
 0x187   : > { %v293_v42 = vmul.f32 %v497_v40, %v277_v26 }
 0x189   : > { %v302_v44 = vmul.f32 %v426_v41, %v293_v42 }
 0x18a   : > { %v499_v45 = vpop.eup %498 }
 0x18b   : > { %v311_v46 = vadd.f32 %v427_v43, %v302_v44  ;;  %v294_v47 = vmul.f32 %v499_v45, %v278_v30 }
 0x18d   : > { %v303_v48 = vmul.f32 %v426_v41, %v294_v47  ;;  %313 = vst.msk [vmem:[%s228_s30] sm:$0xff] %vm238_vm0, %v311_v46 }
 0x18f   : > { %v312_v49 = vadd.f32 %v427_v43, %v303_v48 }
 0x191   : > { %314 = vst.msk [vmem:[%s228_s30 + $0x8] sm:$0xff] %vm238_vm0, %v312_v49 }
 0x192   : > { %567 = shalt.err (!%p564_p0)
}
 0x193   : > { %s568_s10 = scalar_lea.hbm %s809_s14, 256  ;;  %s572_s29 = scalar_lea.hbm %s859_s4, 512 }
 0x194   : > { %p569_p4 = scmp.ne.s32.totalorder %s809_s14, %s568_s10  ;;  %p573_p6 = scmp.lt.s32.totalorder %s809_s14, %s859_s4 }
 0x195   : > { %p574_p13 = scmp.lt.s32.totalorder %s572_s29, %s568_s10 }
 0x196   : > { %p570_p11 = pnand %p569_p4, %p876_p1 }
 0x197   : > { %p575_p3 = por %p574_p13, %p573_p6 }
 0x198   : > { %p571_p5 = pneg %p570_p11 }
 0x19a   : > { %p576_p12 = pnand %p575_p3, %p571_p5 }
 0x19c   : > { %579 = shalt.err (!%p576_p12)
}
 0x19d   : > { %s629_s25 = smov 128   ;;  %s630_s30 = smov 8  }
 0x19e   : > { %441 = dma.vmem_to_hbm [thread:$0]  (%p876_p1), %s811_s12, 256, %s809_s14, %s316_s19, %s629_s25, %s629_s25, %s630_s30  }
 0x19f PF: > { %s344_s7 = sand.u32 1, %s610_s15   ;;  %p877_p7 = scmp.ne.s32.totalorder %s867_s28, 0 }
 0x1a0   : > { %p878_p8 = scmp.ge.s32.totalorder %s622_s18, 2  ;;  %s345_s13 = scalar_lea.sflag [#allocation5], %s344_s7 }
 0x1a2   : > { %p452_p9 = pnand %p878_p8, %p877_p7 }
 0x1a4   : > { %p453_p10 = pneg %p452_p9 }
 0x1a6   : > { %605 = dma.done.wait (%p453_p10), %s345_s13, 256  }
 0x1a7   : > { %607 = vsyncadd (%p453_p10), %s345_s13, 4294967040  ;;  %p18_p2 = scmp.ge.s32.totalorder %s681_s21, 4   ;;  %s879_s15 = smov %s614_s16 }
 0x1a8   : > { %s880_s16 = smov %s618_s17  ;;  %s881_s17 = smov %s693_s24 }
 0x1a9   : > { %s882_s18 = smov %s681_s21  ;;  %20 = sbr.rel (!%p18_p2) target bundleno = 6 (0x6), region = 85 }
 0x1ae   :  { %350 = vsyncpa [#allocation4], 1 }
 0x1af   :  { %352 = vsyncpa [#allocation4 + $0x1], 1 }
 0x1b0   :  { %353 = vsyncpa [#allocation7], 1 }
 0x1b1   :  { %354 = vsyncpa [#allocation5], 1 }
 0x1b2   :  { %356 = vsyncpa [#allocation5 + $0x1], 1 }

</bundles_post_ra>
